<compile_context>
chip_gen: v7x
topology: tpu7x:2x2x1
jax: 0.10.0
libtpu: 0.0.40
codegen_flags: <defaults>
</compile_context>

<pallas_src>
import jax
import jax.numpy as jnp
from jax.experimental import pallas as pl
from jax.experimental.pallas import tpu as pltpu

LANE = 128


def _d_dagger_poly_kernel(coef_ref, intercept_ref, v_ref, xi_ref, o_ref):
    # coef_ref:      SMEM (11,) f32
    # intercept_ref: SMEM (1,)  f32
    # v_ref, xi_ref: VMEM (block_rows, 128) f32
    # o_ref:         VMEM (block_rows, 128) f32
    Vs = jnp.abs(v_ref[...])
    xis = xi_ref[...]
    logV = jnp.log(Vs)          # EUP transcendental (separate VLIW slot)
    xis2 = xis * xis

    c = [coef_ref[k] for k in range(11)]
    b = intercept_ref[0]

    # Factored form of the original 11-term polynomial (identical terms):
    #   b + c2*xi + c3*xi^2
    #     + logV*(c4 + c7*xi + c10*xi^2)
    #     + V*(c0 + c1*V + c5*xi + logV*(c6 + c8*V + c9*xi))
    o_ref[...] = (
        b
        + xis * (c[2] + c[3] * xis)
        + logV * (c[4] + c[7] * xis + c[10] * xis2)
        + Vs * (c[0] + c[1] * Vs + c[5] * xis
                + logV * (c[6] + c[8] * Vs + c[9] * xis))
    )


def d_dagger_poly(x, coef, intercept, *, tile_rows=1024):
    """x: (N, 2) f32, coef: (11,) or (11,1) f32, intercept: scalar -> (N, 1) f32."""
    n = x.shape[0]
    coef = jnp.asarray(coef).reshape(-1).astype(jnp.float32)          # (11,)
    intercept = jnp.reshape(jnp.asarray(intercept), (1,)).astype(jnp.float32)

    # ---- lane-dense re-layout: (N,2) -> V (rows_pad,128) and xi (rows_pad,128) ----
    rows = max(1, -(-n // LANE))
    block_rows = min(tile_rows, rows)
    if block_rows < rows:
        # Tiled case: last-two block dims must obey the (8,128) rule.
        block_rows = max(8, (block_rows // 8) * 8)
    n_blocks = -(-rows // block_rows)
    rows_pad = n_blocks * block_rows
    n_pad = rows_pad * LANE

    v_col = x[:, 0].astype(jnp.float32)
    xi_col = x[:, 1].astype(jnp.float32)
    # Pad V with 1.0 (log(1) = 0) and xi with 0.0 so padded lanes stay finite.
    v2d = jnp.pad(v_col, (0, n_pad - n), constant_values=1.0).reshape(rows_pad, LANE)
    xi2d = jnp.pad(xi_col, (0, n_pad - n), constant_values=0.0).reshape(rows_pad, LANE)

    row_spec = pl.BlockSpec((block_rows, LANE), lambda i: (i, 0))
    smem_spec = pl.BlockSpec(memory_space=pltpu.MemorySpace.SMEM)

    out2d = pl.pallas_call(
        _d_dagger_poly_kernel,
        out_shape=jax.ShapeDtypeStruct((rows_pad, LANE), jnp.float32),
        grid=(n_blocks,),
        in_specs=[smem_spec, smem_spec, row_spec, row_spec],
        out_specs=row_spec,
        compiler_params=pltpu.CompilerParams(
            dimension_semantics=("parallel",)),
        cost_estimate=pl.CostEstimate(
            flops=25 * n_pad,
            transcendentals=n_pad,
            bytes_accessed=12 * n_pad),
    )(coef, intercept, v2d, xi2d)

    return out2d.reshape(-1)[:n].reshape(n, 1)


def d_dagger_poly_ref(x, coef, intercept):
    """Pure-JAX reference mirroring the PyTorch forward."""
    Vs = jnp.abs(x[:, :1])
    xis = x[:, 1:]
    lV = jnp.log(Vs)
    Xin = jnp.concatenate(
        [Vs, Vs ** 2, xis, xis ** 2, lV, Vs * xis,
         lV * Vs, lV * xis, lV * Vs ** 2, Vs * lV * xis, lV * xis ** 2],
        axis=1,
    )
    return Xin @ jnp.asarray(coef).reshape(-1, 1) + intercept


if __name__ == "__main__":
    # Deterministic synthetic parameters (module __init__ shapes: scalar + (11,)).
    intercept = jnp.float32(0.25)
    coef = (jnp.arange(11, dtype=jnp.float32) - 5.0) * 0.1     # (11,)

    key = jax.random.PRNGKey(0)

    # Small batch, not a multiple of 128 -> exercises padding + single-tile grid.
    x = jax.random.normal(key, (300, 2), dtype=jnp.float32)
    # Keep |V| >= 0.5 so log(|V|) is finite (same domain caveat as torch).
    x = x.at[:, 0].set(x[:, 0] + jnp.where(x[:, 0] >= 0, 0.5, -0.5))

    out = jax.block_until_ready(d_dagger_poly(x, coef, intercept))
    ref = d_dagger_poly_ref(x, coef, intercept)
    assert out.shape == (300, 1)
    assert jnp.allclose(out, ref, atol=1e-5, rtol=1e-5)

    # Larger batch with tiny tiles -> exercises the multi-tile pipelined grid path.
    x2 = jax.random.normal(jax.random.PRNGKey(0), (3000, 2), dtype=jnp.float32)
    x2 = x2.at[:, 0].set(x2[:, 0] + jnp.where(x2[:, 0] >= 0, 0.5, -0.5))
    out2 = jax.block_until_ready(d_dagger_poly(x2, coef, intercept, tile_rows=8))
    ref2 = d_dagger_poly_ref(x2, coef, intercept)
    assert out2.shape == (3000, 1)
    assert jnp.allclose(out2, ref2, atol=1e-5, rtol=1e-5)

    print("KERNEL_OK")
</pallas_src>

<mosaic_0001>
module attributes {stable_mosaic.version = 11 : i64} {
  func.func @_d_dagger_poly_kernel(%arg0: i32, %arg1: memref<11xf32, #tpu.memory_space<smem>>, %arg2: memref<1xf32, #tpu.memory_space<smem>>, %arg3: memref<3x128xf32, #tpu.memory_space<vmem>>, %arg4: memref<3x128xf32, #tpu.memory_space<vmem>>, %arg5: memref<3x128xf32, #tpu.memory_space<vmem>>) attributes {dimension_semantics = [#tpu.dimension_semantics<parallel>], iteration_bounds = array<i64: 1>, scalar_prefetch = 0 : i64, scratch_operands = 0 : i64, tpu.core_type = #tpu.core_type<tc>, window_params = [{transform_indices = @transform_0, window_bounds = array<i64: 11>}, {transform_indices = @transform_1, window_bounds = array<i64: 1>}, {transform_indices = @transform_2, window_bounds = array<i64: 3, 128>}, {transform_indices = @transform_3, window_bounds = array<i64: 3, 128>}, {transform_indices = @transform_4, window_bounds = array<i64: 3, 128>}]} {
    %c0 = arith.constant 0 : index
    %c0_0 = arith.constant 0 : index
    %0 = vector.load %arg3[%c0, %c0_0] : memref<3x128xf32, #tpu.memory_space<vmem>>, vector<3x128xf32>
    %1 = math.absf %0 : vector<3x128xf32>
    %c0_1 = arith.constant 0 : index
    %c0_2 = arith.constant 0 : index
    %2 = vector.load %arg4[%c0_1, %c0_2] : memref<3x128xf32, #tpu.memory_space<vmem>>, vector<3x128xf32>
    %3 = math.log %1 : vector<3x128xf32>
    %4 = arith.mulf %2, %2 : vector<3x128xf32>
    %c0_3 = arith.constant 0 : index
    %5 = memref.load %arg1[%c0_3] : memref<11xf32, #tpu.memory_space<smem>>
    %c1 = arith.constant 1 : index
    %6 = memref.load %arg1[%c1] : memref<11xf32, #tpu.memory_space<smem>>
    %c2 = arith.constant 2 : index
    %7 = memref.load %arg1[%c2] : memref<11xf32, #tpu.memory_space<smem>>
    %c3 = arith.constant 3 : index
    %8 = memref.load %arg1[%c3] : memref<11xf32, #tpu.memory_space<smem>>
    %c4 = arith.constant 4 : index
    %9 = memref.load %arg1[%c4] : memref<11xf32, #tpu.memory_space<smem>>
    %c5 = arith.constant 5 : index
    %10 = memref.load %arg1[%c5] : memref<11xf32, #tpu.memory_space<smem>>
    %c6 = arith.constant 6 : index
    %11 = memref.load %arg1[%c6] : memref<11xf32, #tpu.memory_space<smem>>
    %c7 = arith.constant 7 : index
    %12 = memref.load %arg1[%c7] : memref<11xf32, #tpu.memory_space<smem>>
    %c8 = arith.constant 8 : index
    %13 = memref.load %arg1[%c8] : memref<11xf32, #tpu.memory_space<smem>>
    %c9 = arith.constant 9 : index
    %14 = memref.load %arg1[%c9] : memref<11xf32, #tpu.memory_space<smem>>
    %c10 = arith.constant 10 : index
    %15 = memref.load %arg1[%c10] : memref<11xf32, #tpu.memory_space<smem>>
    %c0_4 = arith.constant 0 : index
    %16 = memref.load %arg2[%c0_4] : memref<1xf32, #tpu.memory_space<smem>>
    %17 = vector.broadcast %8 : f32 to vector<3x128xf32>
    %18 = arith.mulf %17, %2 : vector<3x128xf32>
    %19 = vector.broadcast %7 : f32 to vector<3x128xf32>
    %20 = arith.addf %19, %18 : vector<3x128xf32>
    %21 = arith.mulf %2, %20 : vector<3x128xf32>
    %22 = vector.broadcast %16 : f32 to vector<3x128xf32>
    %23 = arith.addf %22, %21 : vector<3x128xf32>
    %24 = vector.broadcast %12 : f32 to vector<3x128xf32>
    %25 = arith.mulf %24, %2 : vector<3x128xf32>
    %26 = vector.broadcast %9 : f32 to vector<3x128xf32>
    %27 = arith.addf %26, %25 : vector<3x128xf32>
    %28 = vector.broadcast %15 : f32 to vector<3x128xf32>
    %29 = arith.mulf %28, %4 : vector<3x128xf32>
    %30 = arith.addf %27, %29 : vector<3x128xf32>
    %31 = arith.mulf %3, %30 : vector<3x128xf32>
    %32 = arith.addf %23, %31 : vector<3x128xf32>
    %33 = vector.broadcast %6 : f32 to vector<3x128xf32>
    %34 = arith.mulf %33, %1 : vector<3x128xf32>
    %35 = vector.broadcast %5 : f32 to vector<3x128xf32>
    %36 = arith.addf %35, %34 : vector<3x128xf32>
    %37 = vector.broadcast %10 : f32 to vector<3x128xf32>
    %38 = arith.mulf %37, %2 : vector<3x128xf32>
    %39 = arith.addf %36, %38 : vector<3x128xf32>
    %40 = vector.broadcast %13 : f32 to vector<3x128xf32>
    %41 = arith.mulf %40, %1 : vector<3x128xf32>
    %42 = vector.broadcast %11 : f32 to vector<3x128xf32>
    %43 = arith.addf %42, %41 : vector<3x128xf32>
    %44 = vector.broadcast %14 : f32 to vector<3x128xf32>
    %45 = arith.mulf %44, %2 : vector<3x128xf32>
    %46 = arith.addf %43, %45 : vector<3x128xf32>
    %47 = arith.mulf %3, %46 : vector<3x128xf32>
    %48 = arith.addf %39, %47 : vector<3x128xf32>
    %49 = arith.mulf %1, %48 : vector<3x128xf32>
    %50 = arith.addf %32, %49 : vector<3x128xf32>
    %c0_5 = arith.constant 0 : index
    %c0_6 = arith.constant 0 : index
    %51 = vector.load %arg5[%c0_5, %c0_6] : memref<3x128xf32, #tpu.memory_space<vmem>>, vector<3x128xf32>
    tpu.vector_store %arg5[%c0_5, %c0_6], %50 {strides = array<i32>} : memref<3x128xf32, #tpu.memory_space<vmem>>, vector<3x128xf32>,
    return
  }
  func.func @transform_0(%arg0: i32) -> i32 {
    %c0_i32 = arith.constant 0 : i32
    %c0_i32_0 = arith.constant 0 : i32
    return %c0_i32 : i32
  }
  func.func @transform_1(%arg0: i32) -> i32 {
    %c0_i32 = arith.constant 0 : i32
    %c0_i32_0 = arith.constant 0 : i32
    return %c0_i32 : i32
  }
  func.func @transform_2(%arg0: i32) -> (i32, i32) {
    %c0_i32 = arith.constant 0 : i32
    %c0_i32_0 = arith.constant 0 : i32
    return %arg0, %c0_i32 : i32, i32
  }
  func.func @transform_3(%arg0: i32) -> (i32, i32) {
    %c0_i32 = arith.constant 0 : i32
    %c0_i32_0 = arith.constant 0 : i32
    return %arg0, %c0_i32 : i32, i32
  }
  func.func @transform_4(%arg0: i32) -> (i32, i32) {
    %c0_i32 = arith.constant 0 : i32
    %c0_i32_0 = arith.constant 0 : i32
    return %arg0, %c0_i32 : i32, i32
  }
}

</mosaic_0001>

<bundles_post_ra>
// kernel: tpu_custom_call.1
= control target key start
LH: loop header
LB: loop body
LE: loop exit
PB: predicated region body
PF: predicated region fallthrough
CT: control target
= control target key end

     0   :  { %10 = vsyncpa [#allocation5], 0  ;;  %s206_s0 = inlined_call_operand.vmem [shape: f32[11], index: 0, kind: input, shape index: {}]   ;;  %s207_s1 = inlined_call_operand.<no memory space> [shape: f32[1], index: 1, kind: input, shape index: {}]   ;;  %s208_s2 = inlined_call_operand.vmem [shape: f32[3,128], index: 2, kind: input, shape index: {}]   ;;  %s209_s3 = inlined_call_operand.vmem [shape: f32[3,128], index: 3, kind: input, shape index: {}]   ;;  %s210_s4 = inlined_call_operand.hbm [shape: f32[3,128], index: 4, kind: output, shape index: {}]  }
   0x1   :  { %11 = vsyncpa [#allocation4], 0  ;;  %s18_s17 = sshll.u32 %s206_s0, 4  ;;  %s19_s17 = int_to_ptr.vmem [resolvable:$true] %s18_s17 }
   0x2   :  { %s114_s18 = scalar_lea.vmem %s19_s17, 16  ;;  %p119_p1 = scmp.lt.s32.totalorder %s19_s17, %s19_s17 }
   0x3   :  { %p115_p0 = scmp.ne.s32.totalorder %s19_s17, %s114_s18  ;;  %p120_p2 = scmp.lt.s32.totalorder %s114_s18, %s114_s18 }
   0x5   :  { %p121_p3 = por %p120_p2, %p119_p1 }
   0x7   :  { %p122_p4 = pnand %p121_p3, %p115_p0 }
   0x9   :  { %125 = shalt.err (!%p122_p4)
}
   0xa   :  { %s152_s19 = smov [#allocation3]  }
   0xb   :  { %21 = dma.vmem_to_smem %s19_s17, 16, %s152_s19, [#allocation5]  }
   0xc   :  { %148 = dma.done.wait [#allocation5], 16  }
   0xd   :  { %149 = vsyncadd [#allocation5], 4294967280 }
   0xe   :  { %31 = sfence }
   0xf   :  { %v32_v0 = vld [vmem:[%s208_s2] sm:$0x7]  ;;  %s38_s22 = sld [smem:[#allocation3]]  ;;  %s100_s0 = sld [smem:[#allocation3 + $0x1]]  ;;  %v55_v21 = vstv %s207_s1 }
  0x10   :  { %v33_v1 = vand.u32 2147483647, %v32_v0  ;;  %s101_s23 = sld [smem:[#allocation3 + $0x2]]  ;;  %s102_s24 = sld [smem:[#allocation3 + $0x3]]  ;;  %v34_v2 = vld [vmem:[%s209_s3] sm:$0x7] }
  0x11   :  { %s185_s25 = sld [smem:[#allocation3 + $0x4]]  ;;  %s104_s26 = sld [smem:[#allocation3 + $0x5]]  ;;  %v37_v5 = vmul.f32 %v34_v2, %v34_v2 }
  0x12   :  { %112 = vlog2.f32 %v33_v1  ;;  %s105_s27 = sld [smem:[#allocation3 + $0x6]]  ;;  %s106_s28 = sld [smem:[#allocation3 + $0x7]] }
  0x13   :  { %s107_s29 = sld [smem:[#allocation3 + $0x8]]  ;;  %s108_s6 = sld [smem:[#allocation3 + $0x9]] }
  0x14   :  { %s109_s7 = sld [smem:[#allocation3 + $0xa]]  ;;  %s153_s8 = smov [#allocation6]  }
  0x15   :  { %v66_v3 = vstv %s100_s0  ;;  %v68_v4 = vstv %s38_s22  ;;  %s91_s9 = sshll.u32 %s153_s8, 4  ;;  %s92_s9 = int_to_ptr.vmem [resolvable:$true] %s91_s9 }
  0x16   :  { %v50_v6 = vstv %s102_s24  ;;  %v52_v7 = vstv %s101_s23  ;;  %v67_v8 = vmul.f32 %v66_v3, %v33_v1  ;;  %s126_s1 = scalar_lea.vmem %s92_s9, 64  ;;  %p131_p6 = scmp.lt.s32.totalorder %s92_s9, %s92_s9 }
  0x17   :  { %v51_v9 = vmul.f32 %v50_v6, %v34_v2  ;;  %v59_v10 = vstv %s185_s25  ;;  %v70_v11 = vstv %s104_s26  ;;  %p127_p5 = scmp.ne.s32.totalorder %s92_s9, %s126_s1  ;;  %p132_p7 = scmp.lt.s32.totalorder %s126_s1, %s126_s1 }
  0x18   :  { %v75_v12 = vstv %s105_s27  ;;  %v57_v13 = vstv %s106_s28  ;;  %v69_v14 = vadd.f32 %v68_v4, %v67_v8  ;;  %v71_v15 = vmul.f32 %v70_v11, %v34_v2 }
  0x19   :  { %v73_v16 = vstv %s107_s29  ;;  %v53_v17 = vadd.f32 %v52_v7, %v51_v9  ;;  %v58_v18 = vmul.f32 %v57_v13, %v34_v2  ;;  %v77_v23 = vstv %s108_s6  ;;  %p133_p8 = por %p132_p7, %p131_p6 }
  0x1a   :  { %v61_v19 = vstv %s109_s7  ;;  %v74_v20 = vmul.f32 %v73_v16, %v33_v1  ;;  %v78_v28 = vmul.f32 %v77_v23, %v34_v2  ;;  %v72_v32 = vadd.f32 %v71_v15, %v69_v14 }
  0x1b   :  { %v62_v22 = vmul.f32 %v61_v19, %v37_v5  ;;  %v54_v25 = vmul.f32 %v53_v17, %v34_v2  ;;  %v60_v26 = vadd.f32 %v59_v10, %v58_v18  ;;  %p134_p9 = pnand %p133_p8, %p127_p5 }
  0x1c   :  { %v113_v24 = vpop.eup %112  ;;  %v76_v27 = vadd.f32 %v75_v12, %v74_v20 }
  0x1d   :  { %v36_v29 = vmul.f32 0.6931472, %v113_v24  ;;  %v56_v30 = vadd.f32 %v55_v21, %v54_v25  ;;  %v63_v31 = vadd.f32 %v62_v22, %v60_v26 }
  0x1e   :  { %v79_v33 = vadd.f32 %v78_v28, %v76_v27 }
  0x1f   :  { %v64_v34 = vmul.f32 %v63_v31, %v36_v29 }
  0x20   :  { %v80_v35 = vmul.f32 %v79_v33, %v36_v29 }
  0x21   :  { %v65_v36 = vadd.f32 %v64_v34, %v56_v30 }
  0x22   :  { %v81_v37 = vadd.f32 %v80_v35, %v72_v32 }
  0x24   :  { %v82_v38 = vmul.f32 %v81_v37, %v33_v1 }
  0x26   :  { %v83_v39 = vadd.f32 %v82_v38, %v65_v36 }
  0x28   :  { %84 = vst [vmem:[#allocation6] sm:$0x7] %v83_v39 }
  0x29   :  { %137 = shalt.err (!%p134_p9)
}
  0x2a   :  { %s138_s12 = scalar_lea.hbm %s210_s4, 64 }
  0x2b   :  { %p139_p10 = scmp.ne.s32.totalorder %s210_s4, %s138_s12  ;;  %p142_p11 = scmp.lt.u32.totalorder %s138_s12, %s210_s4 }
  0x2d   :  { %p144_p12 = pnand %p142_p11, %p139_p10 }
  0x2f   :  { %147 = shalt.err (!%p144_p12)
}
  0x30   :  { %94 = dma.vmem_to_hbm [thread:$0]  %s92_s9, 64, %s210_s4, [#allocation4]  }
  0x31   :  { %150 = dma.done.wait [#allocation4], 64  }
  0x32   :  { %151 = vsyncadd [#allocation4], 4294967232 }
  0x33   :  { %98 = vsyncpa [#allocation4], 1 }
  0x34   :  { %99 = vsyncpa [#allocation5], 1 }

</bundles_post_ra>
